<compile_context>
chip_gen: v7x
topology: tpu7x:2x2x1
jax: 0.10.0
libtpu: 0.0.40
codegen_flags: <defaults>
</compile_context>

<pallas_src>
import functools

import jax
import jax.numpy as jnp
from jax.experimental import pallas as pl
from jax.experimental.pallas import tpu as pltpu


def critic_kernel(obs_ref, act_ref,
                  wo_ref, bo_ref, wa_ref, ba_ref,
                  w1o_ref, w1a_ref, b1_ref,
                  w2_ref, b2_ref,
                  out_ref, *, compute_dtype):
    cd = compute_dtype
    obs = obs_ref[...].astype(cd)
    act = act_ref[...].astype(cd)

    # Branch layer: two small MXU passes (no concat, no block-diag zero padding).
    obs_h = jnp.dot(obs, wo_ref[...].astype(cd),
                    preferred_element_type=jnp.float32) + bo_ref[...]
    obs_h = jnp.maximum(obs_h, 0.0)
    act_h = jnp.dot(act, wa_ref[...].astype(cd),
                    preferred_element_type=jnp.float32) + ba_ref[...]
    act_h = jnp.maximum(act_h, 0.0)

    # Hidden layer: concat([obs_h, act_h]) @ W1 == obs_h @ W1_top + act_h @ W1_bot.
    h1 = jnp.dot(obs_h.astype(cd), w1o_ref[...].astype(cd),
                 preferred_element_type=jnp.float32)
    h1 = h1 + jnp.dot(act_h.astype(cd), w1a_ref[...].astype(cd),
                      preferred_element_type=jnp.float32)
    h1 = jnp.maximum(h1 + b1_ref[...], 0.0)

    # Output projection on the VPU + XLU lane reduce (avoids an N=1 MXU pass).
    q = jnp.sum(h1 * w2_ref[...], axis=-1, keepdims=True) + b2_ref[...]
    out_ref[...] = q.astype(out_ref.dtype)


def critic_forward(observation, action, params, *, use_bf16=False, tb=512):
    B, obs_dim = observation.shape
    act_dim = action.shape[1]
    l0 = params["w_obs"].shape[1]
    hidden = params["w1"].shape[1]

    # One-time (cheap, weight-sized) repacks done in the wrapper.
    w1_top = params["w1"][:l0]        # [L0, H]
    w1_bot = params["w1"][l0:]        # [L0, H]
    w2_row = params["w2"].T           # [1, H]

    # Batch tile: whole batch for small B, `tb`-row tiles (pipelined, parallel
    # across TensorCores) for large B.
    TB = B if B <= tb else tb
    grid = (pl.cdiv(B, TB),)

    compute_dtype = jnp.bfloat16 if use_bf16 else jnp.float32
    kernel = functools.partial(critic_kernel, compute_dtype=compute_dtype)

    def wspec(shape):
        # Weights / biases stay VMEM-resident across all batch tiles.
        return pl.BlockSpec(shape, lambda i: (0, 0))

    return pl.pallas_call(
        kernel,
        out_shape=jax.ShapeDtypeStruct((B, 1), jnp.float32),
        grid=grid,
        in_specs=[
            pl.BlockSpec((TB, obs_dim), lambda i: (i, 0)),  # batch-tiled obs
            pl.BlockSpec((TB, act_dim), lambda i: (i, 0)),  # batch-tiled act
            wspec((obs_dim, l0)), wspec((1, l0)),
            wspec((act_dim, l0)), wspec((1, l0)),
            wspec((l0, hidden)), wspec((l0, hidden)), wspec((1, hidden)),
            wspec((1, hidden)), wspec((1, 1)),
        ],
        out_specs=pl.BlockSpec((TB, 1), lambda i: (i, 0)),
        compiler_params=pltpu.CompilerParams(
            dimension_semantics=("parallel",)),
    )(observation, action,
      params["w_obs"], params["b_obs"],
      params["w_act"], params["b_act"],
      w1_top, w1_bot, params["b1"],
      w2_row, params["b2"])


# ---------------------------------------------------------------------------
# Parameter init (mirrors PyTorch shapes / fan-in uniform) and pure-JAX ref
# ---------------------------------------------------------------------------

def fan_in_uniform(key, shape, fan_in, dtype=jnp.float32):
    bound = 1.0 / jnp.sqrt(jnp.asarray(fan_in, dtype=jnp.float32))
    return jax.random.uniform(key, shape, dtype, minval=-bound, maxval=bound)


def init_params(key, obs_dim, act_dim, l0, hidden):
    # Weights stored as [in, out]; fan-in uniform init (init_fan_in_uniform /
    # PyTorch default bias bound = 1/sqrt(fan_in)).
    ks = jax.random.split(key, 8)
    return {
        "w_obs": fan_in_uniform(ks[0], (obs_dim, l0), obs_dim),
        "b_obs": fan_in_uniform(ks[1], (1, l0), obs_dim),
        "w_act": fan_in_uniform(ks[2], (act_dim, l0), act_dim),
        "b_act": fan_in_uniform(ks[3], (1, l0), act_dim),
        "w1":    fan_in_uniform(ks[4], (2 * l0, hidden), 2 * l0),
        "b1":    fan_in_uniform(ks[5], (1, hidden), 2 * l0),
        "w2":    fan_in_uniform(ks[6], (hidden, 1), hidden),
        "b2":    fan_in_uniform(ks[7], (1, 1), hidden),
    }


def critic_ref(observation, action, p):
    obs_h = jnp.maximum(observation @ p["w_obs"] + p["b_obs"], 0.0)
    act_h = jnp.maximum(action @ p["w_act"] + p["b_act"], 0.0)
    x = jnp.concatenate([obs_h, act_h], axis=1)
    h1 = jnp.maximum(x @ p["w1"] + p["b1"], 0.0)
    return h1 @ p["w2"] + p["b2"]


if __name__ == "__main__":
    # Small shapes: batch=8, obs_dim=24, action_dim=8, config.layers = [32, 32]
    B, OBS_DIM, ACT_DIM, L0, HIDDEN = 8, 24, 8, 32, 32

    key = jax.random.PRNGKey(0)
    k_obs, k_act, k_par = jax.random.split(key, 3)
    observation = jax.random.normal(k_obs, (B, OBS_DIM), dtype=jnp.float32)
    action = jax.random.normal(k_act, (B, ACT_DIM), dtype=jnp.float32)

    params = init_params(k_par, OBS_DIM, ACT_DIM, L0, HIDDEN)

    q = critic_forward(observation, action, params)
    q = jax.block_until_ready(q)

    q_ref = critic_ref(observation, action, params)
    assert q.shape == (B, 1)
    assert jnp.allclose(q, q_ref, atol=1e-5, rtol=1e-5)

    print("KERNEL_OK")
</pallas_src>

<mosaic_0001>
module attributes {stable_mosaic.version = 11 : i64} {
  func.func @critic_kernel(%arg0: i32, %arg1: memref<8x24xf32, #tpu.memory_space<vmem>>, %arg2: memref<8x8xf32, #tpu.memory_space<vmem>>, %arg3: memref<24x32xf32, #tpu.memory_space<vmem>>, %arg4: memref<1x32xf32, #tpu.memory_space<vmem>>, %arg5: memref<8x32xf32, #tpu.memory_space<vmem>>, %arg6: memref<1x32xf32, #tpu.memory_space<vmem>>, %arg7: memref<32x32xf32, #tpu.memory_space<vmem>>, %arg8: memref<32x32xf32, #tpu.memory_space<vmem>>, %arg9: memref<1x32xf32, #tpu.memory_space<vmem>>, %arg10: memref<1x32xf32, #tpu.memory_space<vmem>>, %arg11: memref<1x1xf32, #tpu.memory_space<vmem>>, %arg12: memref<8x1xf32, #tpu.memory_space<vmem>>) attributes {dimension_semantics = [#tpu.dimension_semantics<parallel>], iteration_bounds = array<i64: 1>, scalar_prefetch = 0 : i64, scratch_operands = 0 : i64, tpu.core_type = #tpu.core_type<tc>, window_params = [{transform_indices = @transform_0, window_bounds = array<i64: 8, 24>}, {transform_indices = @transform_1, window_bounds = array<i64: 8, 8>}, {pipeline_mode = #tpu.pipeline_mode<synchronous>, transform_indices = @transform_2, window_bounds = array<i64: 24, 32>}, {pipeline_mode = #tpu.pipeline_mode<synchronous>, transform_indices = @transform_3, window_bounds = array<i64: 1, 32>}, {pipeline_mode = #tpu.pipeline_mode<synchronous>, transform_indices = @transform_4, window_bounds = array<i64: 8, 32>}, {pipeline_mode = #tpu.pipeline_mode<synchronous>, transform_indices = @transform_5, window_bounds = array<i64: 1, 32>}, {pipeline_mode = #tpu.pipeline_mode<synchronous>, transform_indices = @transform_6, window_bounds = array<i64: 32, 32>}, {pipeline_mode = #tpu.pipeline_mode<synchronous>, transform_indices = @transform_7, window_bounds = array<i64: 32, 32>}, {pipeline_mode = #tpu.pipeline_mode<synchronous>, transform_indices = @transform_8, window_bounds = array<i64: 1, 32>}, {pipeline_mode = #tpu.pipeline_mode<synchronous>, transform_indices = @transform_9, window_bounds = array<i64: 1, 32>}, {pipeline_mode = #tpu.pipeline_mode<synchronous>, transform_indices = @transform_10, window_bounds = array<i64: 1, 1>}, {transform_indices = @transform_11, window_bounds = array<i64: 8, 1>}]} {
    %c0 = arith.constant 0 : index
    %c0_0 = arith.constant 0 : index
    %0 = vector.load %arg1[%c0, %c0_0] : memref<8x24xf32, #tpu.memory_space<vmem>>, vector<8x24xf32>
    %c0_1 = arith.constant 0 : index
    %c0_2 = arith.constant 0 : index
    %1 = vector.load %arg2[%c0_1, %c0_2] : memref<8x8xf32, #tpu.memory_space<vmem>>, vector<8x8xf32>
    %c0_3 = arith.constant 0 : index
    %c0_4 = arith.constant 0 : index
    %2 = vector.load %arg3[%c0_3, %c0_4] : memref<24x32xf32, #tpu.memory_space<vmem>>, vector<24x32xf32>
    %cst = arith.constant dense<0.000000e+00> : vector<8x32xf32>
    %3 = tpu.matmul %0, %2, %cst {dimension_numbers = #tpu.dot_dimension_numbers<[1], [0], [0], [1], [0, 0, 1, 1], [], []>} : vector<8x24xf32>, vector<24x32xf32>, vector<8x32xf32> -> vector<8x32xf32>
    %c0_5 = arith.constant 0 : index
    %c0_6 = arith.constant 0 : index
    %4 = vector.load %arg4[%c0_5, %c0_6] : memref<1x32xf32, #tpu.memory_space<vmem>>, vector<1x32xf32>
    %5 = vector.broadcast %4 : vector<1x32xf32> to vector<8x32xf32>
    %6 = arith.addf %3, %5 : vector<8x32xf32>
    %cst_7 = arith.constant 0.000000e+00 : f32
    %7 = vector.broadcast %cst_7 : f32 to vector<8x32xf32>
    %8 = arith.maximumf %6, %7 : vector<8x32xf32>
    %c0_8 = arith.constant 0 : index
    %c0_9 = arith.constant 0 : index
    %9 = vector.load %arg5[%c0_8, %c0_9] : memref<8x32xf32, #tpu.memory_space<vmem>>, vector<8x32xf32>
    %cst_10 = arith.constant dense<0.000000e+00> : vector<8x32xf32>
    %10 = tpu.matmul %1, %9, %cst_10 {dimension_numbers = #tpu.dot_dimension_numbers<[1], [0], [0], [1], [0, 0, 1, 1], [], []>} : vector<8x8xf32>, vector<8x32xf32>, vector<8x32xf32> -> vector<8x32xf32>
    %c0_11 = arith.constant 0 : index
    %c0_12 = arith.constant 0 : index
    %11 = vector.load %arg6[%c0_11, %c0_12] : memref<1x32xf32, #tpu.memory_space<vmem>>, vector<1x32xf32>
    %12 = vector.broadcast %11 : vector<1x32xf32> to vector<8x32xf32>
    %13 = arith.addf %10, %12 : vector<8x32xf32>
    %cst_13 = arith.constant 0.000000e+00 : f32
    %14 = vector.broadcast %cst_13 : f32 to vector<8x32xf32>
    %15 = arith.maximumf %13, %14 : vector<8x32xf32>
    %c0_14 = arith.constant 0 : index
    %c0_15 = arith.constant 0 : index
    %16 = vector.load %arg7[%c0_14, %c0_15] : memref<32x32xf32, #tpu.memory_space<vmem>>, vector<32x32xf32>
    %cst_16 = arith.constant dense<0.000000e+00> : vector<8x32xf32>
    %17 = tpu.matmul %8, %16, %cst_16 {dimension_numbers = #tpu.dot_dimension_numbers<[1], [0], [0], [1], [0, 0, 1, 1], [], []>} : vector<8x32xf32>, vector<32x32xf32>, vector<8x32xf32> -> vector<8x32xf32>
    %c0_17 = arith.constant 0 : index
    %c0_18 = arith.constant 0 : index
    %18 = vector.load %arg8[%c0_17, %c0_18] : memref<32x32xf32, #tpu.memory_space<vmem>>, vector<32x32xf32>
    %cst_19 = arith.constant dense<0.000000e+00> : vector<8x32xf32>
    %19 = tpu.matmul %15, %18, %cst_19 {dimension_numbers = #tpu.dot_dimension_numbers<[1], [0], [0], [1], [0, 0, 1, 1], [], []>} : vector<8x32xf32>, vector<32x32xf32>, vector<8x32xf32> -> vector<8x32xf32>
    %20 = arith.addf %17, %19 : vector<8x32xf32>
    %c0_20 = arith.constant 0 : index
    %c0_21 = arith.constant 0 : index
    %21 = vector.load %arg9[%c0_20, %c0_21] : memref<1x32xf32, #tpu.memory_space<vmem>>, vector<1x32xf32>
    %22 = vector.broadcast %21 : vector<1x32xf32> to vector<8x32xf32>
    %23 = arith.addf %20, %22 : vector<8x32xf32>
    %cst_22 = arith.constant 0.000000e+00 : f32
    %24 = vector.broadcast %cst_22 : f32 to vector<8x32xf32>
    %25 = arith.maximumf %23, %24 : vector<8x32xf32>
    %c0_23 = arith.constant 0 : index
    %c0_24 = arith.constant 0 : index
    %26 = vector.load %arg10[%c0_23, %c0_24] : memref<1x32xf32, #tpu.memory_space<vmem>>, vector<1x32xf32>
    %27 = vector.broadcast %26 : vector<1x32xf32> to vector<8x32xf32>
    %28 = arith.mulf %25, %27 : vector<8x32xf32>
    %cst_25 = arith.constant dense<0.000000e+00> : vector<8xf32>
    %29 = vector.multi_reduction <add>, %28, %cst_25 [1] : vector<8x32xf32> to vector<8xf32>
    %30 = vector.shape_cast %29 : vector<8xf32> to vector<8x1xf32>
    %c0_26 = arith.constant 0 : index
    %c0_27 = arith.constant 0 : index
    %31 = vector.load %arg11[%c0_26, %c0_27] : memref<1x1xf32, #tpu.memory_space<vmem>>, vector<1x1xf32>
    %32 = vector.broadcast %31 : vector<1x1xf32> to vector<8x1xf32>
    %33 = arith.addf %30, %32 : vector<8x1xf32>
    %c0_28 = arith.constant 0 : index
    %c0_29 = arith.constant 0 : index
    %34 = vector.load %arg12[%c0_28, %c0_29] : memref<8x1xf32, #tpu.memory_space<vmem>>, vector<8x1xf32>
    tpu.vector_store %arg12[%c0_28, %c0_29], %33 {strides = array<i32>} : memref<8x1xf32, #tpu.memory_space<vmem>>, vector<8x1xf32>,
    return
  }
  func.func @transform_0(%arg0: i32) -> (i32, i32) {
    %c0_i32 = arith.constant 0 : i32
    %c0_i32_0 = arith.constant 0 : i32
    return %arg0, %c0_i32 : i32, i32
  }
  func.func @transform_1(%arg0: i32) -> (i32, i32) {
    %c0_i32 = arith.constant 0 : i32
    %c0_i32_0 = arith.constant 0 : i32
    return %arg0, %c0_i32 : i32, i32
  }
  func.func @transform_2(%arg0: i32) -> (i32, i32) {
    %c0_i32 = arith.constant 0 : i32
    %c0_i32_0 = arith.constant 0 : i32
    %c0_i32_1 = arith.constant 0 : i32
    return %c0_i32, %c0_i32_0 : i32, i32
  }
  func.func @transform_3(%arg0: i32) -> (i32, i32) {
    %c0_i32 = arith.constant 0 : i32
    %c0_i32_0 = arith.constant 0 : i32
    %c0_i32_1 = arith.constant 0 : i32
    return %c0_i32, %c0_i32_0 : i32, i32
  }
  func.func @transform_4(%arg0: i32) -> (i32, i32) {
    %c0_i32 = arith.constant 0 : i32
    %c0_i32_0 = arith.constant 0 : i32
    %c0_i32_1 = arith.constant 0 : i32
    return %c0_i32, %c0_i32_0 : i32, i32
  }
  func.func @transform_5(%arg0: i32) -> (i32, i32) {
    %c0_i32 = arith.constant 0 : i32
    %c0_i32_0 = arith.constant 0 : i32
    %c0_i32_1 = arith.constant 0 : i32
    return %c0_i32, %c0_i32_0 : i32, i32
  }
  func.func @transform_6(%arg0: i32) -> (i32, i32) {
    %c0_i32 = arith.constant 0 : i32
    %c0_i32_0 = arith.constant 0 : i32
    %c0_i32_1 = arith.constant 0 : i32
    return %c0_i32, %c0_i32_0 : i32, i32
  }
  func.func @transform_7(%arg0: i32) -> (i32, i32) {
    %c0_i32 = arith.constant 0 : i32
    %c0_i32_0 = arith.constant 0 : i32
    %c0_i32_1 = arith.constant 0 : i32
    return %c0_i32, %c0_i32_0 : i32, i32
  }
  func.func @transform_8(%arg0: i32) -> (i32, i32) {
    %c0_i32 = arith.constant 0 : i32
    %c0_i32_0 = arith.constant 0 : i32
    %c0_i32_1 = arith.constant 0 : i32
    return %c0_i32, %c0_i32_0 : i32, i32
  }
  func.func @transform_9(%arg0: i32) -> (i32, i32) {
    %c0_i32 = arith.constant 0 : i32
    %c0_i32_0 = arith.constant 0 : i32
    %c0_i32_1 = arith.constant 0 : i32
    return %c0_i32, %c0_i32_0 : i32, i32
  }
  func.func @transform_10(%arg0: i32) -> (i32, i32) {
    %c0_i32 = arith.constant 0 : i32
    %c0_i32_0 = arith.constant 0 : i32
    %c0_i32_1 = arith.constant 0 : i32
    return %c0_i32, %c0_i32_0 : i32, i32
  }
  func.func @transform_11(%arg0: i32) -> (i32, i32) {
    %c0_i32 = arith.constant 0 : i32
    %c0_i32_0 = arith.constant 0 : i32
    return %arg0, %c0_i32 : i32, i32
  }
}

</mosaic_0001>

<bundles_post_ra>
// kernel: tpu_custom_call.1
= control target key start
LH: loop header
LB: loop body
LE: loop exit
PB: predicated region body
PF: predicated region fallthrough
CT: control target
= control target key end

     0   :  { %s835_s0 = inlined_call_operand.hbm [shape: f32[8,24], index: 0, kind: input, shape index: {}]   ;;  %s836_s1 = inlined_call_operand.hbm [shape: f32[8,8], index: 1, kind: input, shape index: {}]   ;;  %s837_s2 = inlined_call_operand.hbm [shape: f32[24,32], index: 2, kind: input, shape index: {}]   ;;  %s838_s3 = inlined_call_operand.vmem [shape: f32[1,32], index: 3, kind: input, shape index: {}]   ;;  %s839_s4 = inlined_call_operand.vmem [shape: f32[8,32], index: 4, kind: input, shape index: {}]   ;;  %s840_s5 = inlined_call_operand.vmem [shape: f32[1,32], index: 5, kind: input, shape index: {}]   ;;  %s841_s6 = inlined_call_operand.hbm [shape: f32[32,32], index: 6, kind: input, shape index: {}]   ;;  %s842_s7 = inlined_call_operand.hbm [shape: f32[32,32], index: 7, kind: input, shape index: {}]   ;;  %s843_s8 = inlined_call_operand.vmem [shape: f32[1,32], index: 8, kind: input, shape index: {}]   ;;  %s844_s9 = inlined_call_operand.vmem [shape: f32[1,32], index: 9, kind: input, shape index: {}]   ;;  %s845_s10 = inlined_call_operand.<no memory space> [shape: f32[1,1], index: 10, kind: input, shape index: {}]   ;;  %s846_s11 = inlined_call_operand.vmem [shape: f32[8,1], index: 11, kind: output, shape index: {}]  }
   0x1   :  { %v16_v0 = vstv %s845_s10 }
   0x2   :  { %17 = vst [vmem:[#allocation2] sm:$0x1] %v16_v0 }
   0x3   :  { %18 = vsyncpa [#allocation4], 0 }
   0x4   :  { %19 = vsyncpa [#allocation6], 0 }
   0x5   :  { %20 = vsyncpa [#allocation9], 0  ;;  %s668_s19 = smov [#allocation5]   ;;  %s552_s23 = scalar_lea.hbm %s836_s1, 128 }
   0x6   :  { %s37_s20 = sshll.u32 %s668_s19, 4  ;;  %p553_p0 = scmp.ne.s32.totalorder %s836_s1, %s552_s23  ;;  %s38_s20 = int_to_ptr.vmem [resolvable:$true] %s37_s20 }
   0x7   :  { %p556_p1 = scmp.lt.u32.totalorder %s552_s23, %s836_s1 }
   0x9   :  { %p558_p2 = pnand %p556_p1, %p553_p0 }
   0xb   :  { %561 = shalt.err (!%p558_p2)
}
   0xc   :  { %s562_s10 = scalar_lea.vmem %s38_s20, 128  ;;  %p567_p4 = scmp.lt.s32.totalorder %s38_s20, %s38_s20 }
   0xd   :  { %p563_p3 = scmp.ne.s32.totalorder %s38_s20, %s562_s10  ;;  %p568_p5 = scmp.lt.s32.totalorder %s562_s10, %s562_s10 }
   0xf   :  { %p569_p6 = por %p568_p5, %p567_p4 }
  0x11   :  { %p570_p7 = pnand %p569_p6, %p563_p3 }
  0x13   :  { %573 = shalt.err (!%p570_p7)
}
  0x14   :  { %40 = dma.hbm_to_vmem [thread:$0]  %s836_s1, 128, %s38_s20, [#allocation6]  }
  0x15   :  { %s669_s30 = smov [#allocation8]   ;;  %s670_s13 = smov [#allocation3]  }
  0x16   :  { %s64_s12 = sshll.u32 %s669_s30, 4  ;;  %s27_s14 = sshll.u32 %s670_s13, 4  ;;  %s65_s12 = int_to_ptr.vmem [resolvable:$true] %s64_s12  ;;  %s28_s14 = int_to_ptr.vmem [resolvable:$true] %s27_s14 }
  0x17   :  { %s574_s17 = scalar_lea.hbm %s841_s6, 512 }
  0x18   :  { %p575_p8 = scmp.ne.s32.totalorder %s841_s6, %s574_s17  ;;  %p578_p9 = scmp.lt.u32.totalorder %s574_s17, %s841_s6 }
  0x1a   :  { %p580_p10 = pnand %p578_p9, %p575_p8 }
  0x1c   :  { %583 = shalt.err (!%p580_p10)
}
  0x1d   :  { %s584_s1 = scalar_lea.vmem %s65_s12, 512  ;;  %p589_p12 = scmp.lt.s32.totalorder %s65_s12, %s65_s12 }
  0x1e   :  { %p585_p11 = scmp.ne.s32.totalorder %s65_s12, %s584_s1  ;;  %p590_p13 = scmp.lt.s32.totalorder %s584_s1, %s584_s1 }
  0x20   :  { %p591_p0 = por %p590_p13, %p589_p12 }
  0x22   :  { %p592_p1 = pnand %p591_p0, %p585_p11 }
  0x24   :  { %595 = shalt.err (!%p592_p1)
}
  0x25   :  { %s671_s20 = smov 128   ;;  %s672_s23 = smov 8  }
  0x26   :  { %70 = dma.hbm_to_vmem [thread:$0]  %s841_s6, 512, %s65_s12, [#allocation9], %s671_s20, %s671_s20, %s672_s23  }
  0x27   :  { %s596_s10 = scalar_lea.hbm %s835_s0, 128 }
  0x28   :  { %p597_p2 = scmp.ne.s32.totalorder %s835_s0, %s596_s10  ;;  %p600_p3 = scmp.lt.u32.totalorder %s596_s10, %s835_s0 }
  0x2a   :  { %p602_p4 = pnand %p600_p3, %p597_p2 }
  0x2c   :  { %605 = shalt.err (!%p602_p4)
}
  0x2d   :  { %s606_s15 = scalar_lea.vmem %s28_s14, 128  ;;  %p611_p6 = scmp.lt.s32.totalorder %s28_s14, %s28_s14 }
  0x2e   :  { %p607_p5 = scmp.ne.s32.totalorder %s28_s14, %s606_s15  ;;  %p612_p7 = scmp.lt.s32.totalorder %s606_s15, %s606_s15 }
  0x30   :  { %p613_p8 = por %p612_p7, %p611_p6 }
  0x32   :  { %p614_p9 = pnand %p613_p8, %p607_p5 }
  0x34   :  { %617 = shalt.err (!%p614_p9)
}
  0x35   :  { %30 = dma.hbm_to_vmem [thread:$0]  %s835_s0, 128, %s28_s14, [#allocation4]  }
  0x36   :  { %s673_s16 = smov [#allocation7]   ;;  %s674_s18 = smov [#allocation10]  }
  0x37   :  { %s46_s17 = sshll.u32 %s673_s16, 4  ;;  %s76_s19 = sshll.u32 %s674_s18, 4  ;;  %s47_s17 = int_to_ptr.vmem [resolvable:$true] %s46_s17  ;;  %s77_s19 = int_to_ptr.vmem [resolvable:$true] %s76_s19 }
  0x38   :  { %s618_s1 = scalar_lea.hbm %s837_s2, 384 }
  0x39   :  { %p619_p10 = scmp.ne.s32.totalorder %s837_s2, %s618_s1  ;;  %p622_p11 = scmp.lt.u32.totalorder %s618_s1, %s837_s2 }
  0x3b   :  { %p624_p12 = pnand %p622_p11, %p619_p10 }
  0x3d   :  { %627 = shalt.err (!%p624_p12)
}
  0x3e   :  { %s628_s0 = scalar_lea.vmem %s47_s17, 384  ;;  %p633_p0 = scmp.lt.s32.totalorder %s47_s17, %s47_s17 }
  0x3f   :  { %p629_p13 = scmp.ne.s32.totalorder %s47_s17, %s628_s0  ;;  %p634_p1 = scmp.lt.s32.totalorder %s628_s0, %s628_s0 }
  0x41   :  { %p635_p2 = por %p634_p1, %p633_p0 }
  0x43   :  { %p636_p3 = pnand %p635_p2, %p629_p13 }
  0x45   :  { %639 = shalt.err (!%p636_p3)
}
  0x46   :  { %52 = dma.hbm_to_vmem [thread:$0]  %s837_s2, 384, %s47_s17, [#allocation6], %s671_s20, %s671_s20, %s672_s23  }
  0x47   :  { %s640_s30 = scalar_lea.hbm %s842_s7, 512 }
  0x48   :  { %p641_p4 = scmp.ne.s32.totalorder %s842_s7, %s640_s30  ;;  %p644_p5 = scmp.lt.u32.totalorder %s640_s30, %s842_s7 }
  0x4a   :  { %p646_p6 = pnand %p644_p5, %p641_p4 }
  0x4c   :  { %649 = shalt.err (!%p646_p6)
}
  0x4d   :  { %s650_s16 = scalar_lea.vmem %s77_s19, 512  ;;  %p655_p8 = scmp.lt.s32.totalorder %s77_s19, %s77_s19 }
  0x4e   :  { %p651_p7 = scmp.ne.s32.totalorder %s77_s19, %s650_s16  ;;  %p656_p9 = scmp.lt.s32.totalorder %s650_s16, %s650_s16 }
  0x50   :  { %p657_p10 = por %p656_p9, %p655_p8 }
  0x52   :  { %p658_p11 = pnand %p657_p10, %p651_p7 }
  0x54   :  { %661 = shalt.err (!%p658_p11)
}
  0x55   :  { %82 = dma.hbm_to_vmem [thread:$0]  %s842_s7, 512, %s77_s19, [#allocation9], %s671_s20, %s671_s20, %s672_s23  }
  0x56   :  { %662 = dma.done.wait [#allocation4], 128  }
  0x57   :  { %663 = vsyncadd [#allocation4], 4294967168 }
  0x58   :  { %664 = dma.done.wait [#allocation6], 512  }
  0x59   :  { %665 = vsyncadd [#allocation6], 4294966784 }
  0x5a   :  { %666 = dma.done.wait [#allocation9], 1024  }
  0x5b   :  { %667 = vsyncadd [#allocation9], 4294966272  ;;  %v675_v1 = vmov 0.0|0.0   ;;  %v676_v2 = vmov 0.0   ;;  %vm677_vm0 = vmmov 0   ;;  %vm199_vm1 = vcmask 64512  }
  0x5c   :  { %527 = vmatprep.subr.bf16.mxu0 %v675_v1  ;;  %500 = vmatprep.subr.mxu1 %v676_v2  ;;  %v106_v3 = vld [vmem:[#allocation7] sm:$0xff]  ;;  %v107_v4 = vld [vmem:[#allocation7 + $0x8] sm:$0xff]  ;;  %v105_v7 = vld [vmem:[#allocation5] sm:$0xff]  ;;  %vm116_vm2 = vcmask 195584   ;;  %vm282_vm3 = vcmask 261120   ;;  %vm457_vm4 = vcmask 7168  }
  0x5d   :  { %502 = vmatprep.mubr.msk.f32.mxu1 %vm677_vm0, %v676_v2  ;;  %497 = vmatprep.mubr.msk.f32.mxu0 %vm677_vm0, %v676_v2  ;;  %v191_v5 = vld [vmem:[%s839_s4] sm:$0xff]  ;;  %v528_v6 = vpack.c.bf16 %v107_v4, %v106_v3  ;;  %v278_v8 = vld [vmem:[#allocation10] sm:$0xff]  ;;  %v279_v9 = vld [vmem:[#allocation10 + $0x8] sm:$0xff] }
  0x5e   :  { %501 = vmatpush3.msra.mxu1 %v191_v5  ;;  %v274_v10 = vld [vmem:[#allocation8] sm:$0xff]  ;;  %v531_v11 = vpack.c.bf16 %v279_v9, %v278_v8  ;;  %v275_v12 = vld [vmem:[#allocation8 + $0x8] sm:$0xff]  ;;  %v108_v13 = vld [vmem:[#allocation7 + $0x10] sm:$0xff] }
  0x5f   :  { %503 = vmatmul.mubr.msk.f32.vlgmr.msra.gmra.mrb[0].mxu1 %vm199_vm1, %v105_v7  ;;  %530 = vmatprep.subr.bf16.mxu1 %v675_v1  ;;  %v104_v14 = vld [vmem:[#allocation3] sm:$0xff]  ;;  %v537_v15 = vpack.c.bf16 %v275_v12, %v274_v10  ;;  %v280_v16 = vld [vmem:[#allocation10 + $0x10] sm:$0xff] }
  0x60   :  { %529 = vmatpush3.bf16.msra.mxu0 %v528_v6  ;;  %513 = vmatprep.mubr.msk.f32.mxu1 %vm677_vm0, %v676_v2  ;;  %v281_v17 = vld [vmem:[#allocation10 + $0x18] sm:$0xff]  ;;  %v276_v19 = vld [vmem:[#allocation8 + $0x10] sm:$0xff] }
  0x61   :  { %495 = vmatprep.subr.mxu0 %v676_v2  ;;  %532 = vmatpush3.bf16.msra.mxu1 %v531_v11  ;;  %v534_v18 = vpack.c.bf16 %v281_v17, %v280_v16  ;;  %v277_v20 = vld [vmem:[#allocation8 + $0x18] sm:$0xff]  ;;  %v468_v22 = vld [vmem:[%s840_s5] ss:$0 sm:$0xff] }
  0x62   :  { %533 = vmatprep.subr.bf16.mxu1 %v675_v1  ;;  %v540_v21 = vpack.c.bf16 %v277_v20, %v276_v19  ;;  %v466_v27 = vld [vmem:[%s838_s3] ss:$0 sm:$0xff] }
  0x63   :  { %v472_v35 = vld [vmem:[%s843_s8] ss:$0 sm:$0xff] }
  0x64   :  { %496 = vmatpush3.msra.mxu0 %v108_v13  ;;  %v473_v39 = vld [vmem:[%s844_s9] ss:$0 sm:$0xff] }
  0x65   :  { %498 = vmatmul.mubr.msk.f32.vlgmr.msra.gmra.mrb[0].mxu0 %vm116_vm2, %v104_v14  ;;  %536 = vmatprep.subr.bf16.mxu0 %v675_v1  ;;  %v474_v43 = vld [vmem:[#allocation2] ss:$0 sm:$0xff] }
  0x66   :  { %538 = vmatpush3.bf16.msra.mxu0 %v537_v15  ;;  %524 = vmatprep.mubr.msk.f32.mxu0 %vm677_vm0, %v676_v2 }
  0x67   :  { %539 = vmatprep.subr.bf16.mxu0 %v675_v1  ;;  %535 = vmatpush3.bf16.msra.mxu1 %v534_v18 }
  0x6a   :  { %541 = vmatpush3.bf16.msra.mxu0 %v540_v21 }
 0x132   :  { %v269_v23 = vpop.f32.mrb[0].mxu1 }
 0x133   :  { %v270_v24 = vadd.f32 %v468_v22, %v269_v23  ;;  %v504_v25 = vpop.f32.mrb[1].mxu1 }
 0x135   :  { %v273_v26 = vmax.f32 %v270_v24, 0.0 }
 0x137   :  { %514 = vmatmul.mubr.msk.f32.vlgmr.msra.gmra.mrb[2].mxu1 %vm282_vm3, %v273_v26 }
 0x138   :  { %v186_v28 = vpop.f32.mrb[0].mxu0 }
 0x139   :  { %v187_v29 = vadd.f32 %v466_v27, %v186_v28  ;;  %v499_v30 = vpop.f32.mrb[1].mxu0 }
 0x13b   :  { %v190_v31 = vmax.f32 %v187_v29, 0.0 }
 0x13d   :  { %525 = vmatmul.mubr.msk.f32.vlgmr.msra.gmra.mrb[2].mxu0 %vm282_vm3, %v190_v31 }
 0x20a   :  { %v352_v32 = vpop.f32.mrb[2].mxu1 }
 0x20b   :  { %v515_v33 = vpop.f32.mrb[3].mxu1 }
 0x210   :  { %v425_v34 = vpop.f32.mrb[2].mxu0 }
 0x211   :  { %v426_v36 = vadd.f32 %v425_v34, %v352_v32  ;;  %v526_v37 = vpop.f32.mrb[3].mxu0 }
 0x213   :  { %v436_v38 = vadd.f32 %v472_v35, %v426_v36 }
 0x215   :  { %v437_v40 = vmax.f32 %v436_v38, 0.0 }
 0x217   :  { %v445_v41 = vmul.f32 %v473_v39, %v437_v40 }
 0x219   :  { %v446_v42 = vsel %vm282_vm3, %v445_v41, 0.0 }
 0x21a   :  { %447 = vadd.xlane.f32.xlu0 %v446_v42 }
 0x2a7   :  { %v448_v44 = vpop.xlane.xlu0 %447 }
 0x2a8   :  { %v456_v45 = vadd.f32 %v474_v43, %v448_v44 }
 0x2aa   :  { %458 = vst.msk [vmem:[%s846_s11] sm:$0xff] %vm457_vm4, %v456_v45 }
 0x2ab   :  { %463 = vsyncpa [#allocation4], 1 }
 0x2ac   :  { %464 = vsyncpa [#allocation6], 1 }
 0x2ad   :  { %465 = vsyncpa [#allocation9], 1 }

</bundles_post_ra>
